<compile_context>
chip_gen: v5e
topology: v5e:2x2
jax: 0.10.0
libtpu: 0.0.40
codegen_flags: <defaults>
</compile_context>

<pallas_src>
import math
import re
import functools

import jax
import jax.numpy as jnp
from jax.experimental import pallas as pl
from jax.experimental.pallas import tpu as pltpu


def _round_up(x: int, m: int) -> int:
    return ((x + m - 1) // m) * m


def _round_down(x: int, m: int) -> int:
    return (x // m) * m


def _cdiv(a: int, b: int) -> int:
    return (a + b - 1) // b


def _tpu_generation():
    """Best-effort TPU generation from device_kind ('TPU v5e' -> 5, 'TPU7x' -> 7)."""
    try:
        kind = jax.devices()[0].device_kind
    except Exception:
        return None
    m = re.search(r"(\d+)", str(kind))
    return int(m.group(1)) if m else None


def _hw_config():
    """Per-generation VMEM budget (bytes usable for tiling math), compiler VMEM
    limit, MXU operand dtype, and whether to force >=2 batch grid steps."""
    gen = _tpu_generation()
    if gen is None:
        return dict(vmem_limit=32 << 20, budget=24 << 20,
                    mxu_dtype=jnp.float32, two_steps=False)
    if gen >= 7:    # v7x: 64 MiB VMEM per TC, 2 TCs, bf16-native MXU
        return dict(vmem_limit=52 << 20, budget=40 << 20,
                    mxu_dtype=jnp.bfloat16, two_steps=True)
    if gen == 6:    # v6e: 128 MiB VMEM, bf16-native MXU
        return dict(vmem_limit=100 << 20, budget=80 << 20,
                    mxu_dtype=jnp.bfloat16, two_steps=False)
    if gen == 5:    # v5e/v5p: 128 MiB VMEM; keep f32 (VPU/EUP have no bf16 path)
        return dict(vmem_limit=100 << 20, budget=80 << 20,
                    mxu_dtype=jnp.float32, two_steps=False)
    # older / unknown generations: conservative
    return dict(vmem_limit=48 << 20, budget=36 << 20,
                mxu_dtype=jnp.float32, two_steps=False)


def _rbf_kernel(x_ref, c_ref, wt_ref, o_ref, acc_ref, ssum_ref):
    """One (batch tile, Nc tile) step of the RBF forward.

    x_ref   : [TB, Fin+2]       augmented inputs  [x, ||x||^2, 1]
    c_ref   : [Fin+2, TNC]      augmented centers [2 s^2 c^T ; -s^2 ; -s^2 ||c||^2]
    wt_ref  : [TNC, Fout_pad]   weights^T (zero-padded rows/cols)
    o_ref   : [TB, Fout_pad]    final output tile (written on the last Nc step)
    acc_ref : [TB, Fout_pad] f32 scratch — unnormalized output accumulator
    ssum_ref: [TB, 1]        f32 scratch — phi row-sum accumulator
    """
    k = pl.program_id(1)

    @pl.when(k == 0)
    def _():
        acc_ref[...] = jnp.zeros_like(acc_ref)
        ssum_ref[...] = jnp.zeros_like(ssum_ref)

    # Single MXU contraction produces the full Gaussian exponent
    #   e[b,n] = -s_n^2 * ||x_b - c_n||^2
    # The min(.,0) clamp guards against catastrophic-cancellation positives.
    x = x_ref[...].astype(c_ref.dtype)
    e = jnp.dot(x, c_ref[...], preferred_element_type=jnp.float32)   # [TB, TNC]
    phi = jnp.exp(jnp.minimum(e, 0.0))                                # EUP

    ssum_ref[...] += jnp.sum(phi, axis=-1, keepdims=True)             # [TB, 1]
    acc_ref[...] += jnp.dot(phi.astype(wt_ref.dtype), wt_ref[...],
                            preferred_element_type=jnp.float32)       # [TB, Fout_pad]

    @pl.when(k == pl.num_programs(1) - 1)
    def _():
        # Exact reciprocal on a tiny [TB,1] tensor (parity with the torch module).
        inv = 1.0 / (1e-9 + ssum_ref[...])
        o_ref[...] = (acc_ref[...] * inv).astype(o_ref.dtype)


@functools.partial(jax.jit, static_argnames=("block_b", "block_nc"))
def rbf_layer_forward(x, centers, log_shapes, weights, *, block_b=4096, block_nc=2048):
    """x: [B, Fin] f32; centers: [Nc, Fin]; log_shapes: [Nc]; weights: [Fout, Nc]."""
    cfg = _hw_config()
    mxu_dtype = cfg["mxu_dtype"]
    dsz = jnp.dtype(mxu_dtype).itemsize

    x = jnp.asarray(x, jnp.float32)
    centers = jnp.asarray(centers, jnp.float32)
    log_shapes = jnp.asarray(log_shapes, jnp.float32)
    weights = jnp.asarray(weights, jnp.float32)

    B, Fin = x.shape
    Fout, Nc = weights.shape

    # ---- Nc tiling (lane axis): pad to 128, tile to block_nc ----
    block_nc = max(128, _round_up(block_nc, 128))
    Nc_pad = _round_up(max(Nc, 128), 128)
    if Nc_pad > block_nc:
        TNC = block_nc
        Nc_pad = _round_up(Nc_pad, TNC)
    else:
        TNC = Nc_pad
    nkc = Nc_pad // TNC

    # ---- Fout padded to a lane-dense 128 multiple ----
    Fout_pad = _round_up(max(Fout, 128), 128)

    # ---- batch tile size derived from the per-generation VMEM budget ----
    # Double-buffered constant tiles (c_aug, wt) + per-row cost of x/out blocks,
    # f32 accumulators, and ~4x [TB,TNC] f32 headroom for the e/phi temporaries.
    fixed = 2 * (Fin + 2) * TNC * dsz + 2 * TNC * Fout_pad * dsz
    per_row = (2 * (Fin + 2) * 4        # x_aug block, double-buffered
               + 2 * Fout_pad * 4       # output block, double-buffered
               + Fout_pad * 4 + 4       # f32 scratch accumulators
               + 4 * TNC * 4)           # e/phi/cast temporaries headroom
    tb_budget = max((cfg["budget"] - fixed) // per_row, 8)
    TB_target = max(8, min(int(block_b), _round_down(int(tb_budget), 8)))

    # Balanced batch tiling: padding waste stays below one tile.
    nb = _cdiv(B, TB_target)
    if cfg["two_steps"] and nb == 1 and B > 8:
        nb = 2      # make sure both v7x TensorCores get work via the parallel axis
    TB = _round_up(_cdiv(B, nb), 8)
    B_pad = nb * TB

    # ---- wrapper-side layout plumbing (pure XLA, outside the kernel) ----
    s2 = log_shapes * log_shapes                                   # [Nc]
    cn2 = jnp.sum(centers * centers, axis=-1)                      # [Nc]

    # Augmented centers: e = X_aug @ C_aug  ==  -s^2 * ||x - c||^2  per real column.
    c_aug = jnp.zeros((Fin + 2, Nc_pad), jnp.float32)
    c_aug = c_aug.at[:Fin, :Nc].set((2.0 * s2)[None, :] * centers.T)
    c_aug = c_aug.at[Fin, :Nc].set(-s2)
    c_aug = c_aug.at[Fin + 1, :Nc].set(-s2 * cn2)
    # Padded columns: finite sentinel (also finite in bf16) -> exp -> exactly 0.
    c_aug = c_aug.at[Fin + 1, Nc:].set(-1e30)
    c_aug = c_aug.astype(mxu_dtype)

    wt = jnp.zeros((Nc_pad, Fout_pad), jnp.float32).at[:Nc, :Fout].set(weights.T)
    wt = wt.astype(mxu_dtype)

    # Augmented inputs: [x, ||x||^2, 1].  Padded rows are all-zero (harmless).
    xn2 = jnp.sum(x * x, axis=-1, keepdims=True)
    x_aug = jnp.concatenate([x, xn2, jnp.ones_like(xn2)], axis=-1)  # [B, Fin+2]
    if B_pad != B:
        x_aug = jnp.pad(x_aug, ((0, B_pad - B), (0, 0)))

    out = pl.pallas_call(
        _rbf_kernel,
        out_shape=jax.ShapeDtypeStruct((B_pad, Fout_pad), jnp.float32),
        grid=(nb, nkc),
        in_specs=[
            pl.BlockSpec((TB, Fin + 2), lambda i, k: (i, 0)),      # x_aug: batch-tiled
            pl.BlockSpec((Fin + 2, TNC), lambda i, k: (0, k)),     # C_aug: Nc-tiled
            pl.BlockSpec((TNC, Fout_pad), lambda i, k: (k, 0)),    # W^T:   Nc-tiled
        ],
        out_specs=pl.BlockSpec((TB, Fout_pad), lambda i, k: (i, 0)),
        scratch_shapes=[
            pltpu.VMEM((TB, Fout_pad), jnp.float32),               # output accumulator
            pltpu.VMEM((TB, 1), jnp.float32),                      # phi row-sum
        ],
        compiler_params=pltpu.CompilerParams(
            dimension_semantics=("parallel", "arbitrary"),         # batch || , Nc reduce
            vmem_limit_bytes=cfg["vmem_limit"],
        ),
    )(x_aug, c_aug, wt)
    return out[:B, :Fout]


def rbf_layer_reference(x, centers, log_shapes, weights):
    """Pure-JAX reference mirroring the PyTorch module exactly."""
    diff = x[:, None, :] - centers[None, :, :]
    r = jnp.sqrt(jnp.sum(jnp.abs(diff) ** 2, axis=-1))
    kern = log_shapes[None, :] * r
    phi = jnp.exp(-(kern ** 2))
    phi = phi / (1e-9 + jnp.sum(phi, axis=-1, keepdims=True))
    return (weights @ phi.T).T


def init_params(key, input_dim, output_dim, num_centers,
                centers_scale=1.0, std_shapes=0.1, gain_weights=1.0):
    """Deterministic init mirroring RBFLayer.reset()."""
    k_c, k_s, k_w = jax.random.split(key, 3)
    centers = jax.random.uniform(
        k_c, (num_centers, input_dim), jnp.float32,
        minval=-centers_scale, maxval=centers_scale)
    log_shapes = std_shapes * jax.random.normal(k_s, (num_centers,), jnp.float32)
    # xavier_uniform on weights [Fout, Nc]: fan_in = Nc, fan_out = Fout
    limit = gain_weights * math.sqrt(6.0 / (num_centers + output_dim))
    weights = jax.random.uniform(
        k_w, (output_dim, num_centers), jnp.float32, minval=-limit, maxval=limit)
    return centers, log_shapes, weights


if __name__ == "__main__":
    key = jax.random.PRNGKey(0)

    # --- test 1: module-sized small case (single batch tile, single Nc tile) ---
    B, input_dim, output_dim, num_centers = 8, 16, 8, 100
    k_x, k_p = jax.random.split(key)
    x = jax.random.normal(k_x, (B, input_dim), jnp.float32)
    centers, log_shapes, weights = init_params(k_p, input_dim, output_dim, num_centers)

    out = jax.block_until_ready(rbf_layer_forward(x, centers, log_shapes, weights))
    ref = rbf_layer_reference(x, centers, log_shapes, weights)
    assert out.shape == (B, output_dim)
    # Tolerance covers the MXU distance reformulation and (on v6e/v7x) bf16 MXU operands.
    assert jnp.allclose(out, ref, atol=2e-3, rtol=2e-3), (
        f"max abs err = {jnp.max(jnp.abs(out - ref))}")

    # --- test 2: exercise the multi-tile (batch grid + Nc-reduction grid) path ---
    B2, Nc2 = 24, 300
    k_x2, k_p2 = jax.random.split(jax.random.PRNGKey(1))
    x2 = jax.random.normal(k_x2, (B2, input_dim), jnp.float32)
    c2, s2_, w2 = init_params(k_p2, input_dim, output_dim, Nc2)
    out2 = jax.block_until_ready(
        rbf_layer_forward(x2, c2, s2_, w2, block_b=8, block_nc=128))
    ref2 = rbf_layer_reference(x2, c2, s2_, w2)
    assert out2.shape == (B2, output_dim)
    assert jnp.allclose(out2, ref2, atol=2e-3, rtol=2e-3), (
        f"max abs err = {jnp.max(jnp.abs(out2 - ref2))}")

    print("KERNEL_OK")
</pallas_src>

<mosaic_0001>
module attributes {stable_mosaic.version = 11 : i64} {
  func.func @_rbf_kernel(%arg0: i32, %arg1: i32, %arg2: memref<8x18xf32, #tpu.memory_space<vmem>>, %arg3: memref<18x128xf32, #tpu.memory_space<vmem>>, %arg4: memref<128x128xf32, #tpu.memory_space<vmem>>, %arg5: memref<8x128xf32, #tpu.memory_space<vmem>>, %arg6: memref<8x128xf32, #tpu.memory_space<vmem>>, %arg7: memref<8x1xf32, #tpu.memory_space<vmem>>) attributes {dimension_semantics = [#tpu.dimension_semantics<parallel>, #tpu.dimension_semantics<arbitrary>], iteration_bounds = array<i64: 1, 1>, scalar_prefetch = 0 : i64, scratch_operands = 2 : i64, tpu.core_type = #tpu.core_type<tc>, window_params = [{transform_indices = @transform_0, window_bounds = array<i64: 8, 18>}, {transform_indices = @transform_1, window_bounds = array<i64: 18, 128>}, {transform_indices = @transform_2, window_bounds = array<i64: 128, 128>}, {transform_indices = @transform_3, window_bounds = array<i64: 8, 128>}]} {
    %c0_i32 = arith.constant 0 : i32
    %0 = arith.cmpi eq, %arg1, %c0_i32 : i32
    %1 = arith.extui %0 : i1 to i32
    %c0_i32_0 = arith.constant 0 : i32
    %2 = arith.cmpi ne, %1, %c0_i32_0 : i32
    scf.if %2 {
      %cst_19 = arith.constant 0.000000e+00 : f32
      %22 = vector.broadcast %cst_19 : f32 to vector<8x128xf32>
      %c0_20 = arith.constant 0 : index
      %c0_21 = arith.constant 0 : index
      %23 = vector.load %arg6[%c0_20, %c0_21] : memref<8x128xf32, #tpu.memory_space<vmem>>, vector<8x128xf32>
      tpu.vector_store %arg6[%c0_20, %c0_21], %22 {strides = array<i32>} : memref<8x128xf32, #tpu.memory_space<vmem>>, vector<8x128xf32>,
      %cst_22 = arith.constant 0.000000e+00 : f32
      %24 = vector.broadcast %cst_22 : f32 to vector<8x1xf32>
      %c0_23 = arith.constant 0 : index
      %c0_24 = arith.constant 0 : index
      %25 = vector.load %arg7[%c0_23, %c0_24] : memref<8x1xf32, #tpu.memory_space<vmem>>, vector<8x1xf32>
      tpu.vector_store %arg7[%c0_23, %c0_24], %24 {strides = array<i32>} : memref<8x1xf32, #tpu.memory_space<vmem>>, vector<8x1xf32>,
    } else {
    }
    %c0 = arith.constant 0 : index
    %c0_1 = arith.constant 0 : index
    %3 = vector.load %arg2[%c0, %c0_1] : memref<8x18xf32, #tpu.memory_space<vmem>>, vector<8x18xf32>
    %c0_2 = arith.constant 0 : index
    %c0_3 = arith.constant 0 : index
    %4 = vector.load %arg3[%c0_2, %c0_3] : memref<18x128xf32, #tpu.memory_space<vmem>>, vector<18x128xf32>
    %cst = arith.constant dense<0.000000e+00> : vector<8x128xf32>
    %5 = tpu.matmul %3, %4, %cst {dimension_numbers = #tpu.dot_dimension_numbers<[1], [0], [0], [1], [0, 0, 1, 1], [], []>} : vector<8x18xf32>, vector<18x128xf32>, vector<8x128xf32> -> vector<8x128xf32>
    %cst_4 = arith.constant 0.000000e+00 : f32
    %6 = vector.broadcast %cst_4 : f32 to vector<8x128xf32>
    %7 = arith.minimumf %5, %6 : vector<8x128xf32>
    %8 = math.exp %7 : vector<8x128xf32>
    %c0_5 = arith.constant 0 : index
    %c0_6 = arith.constant 0 : index
    %9 = vector.load %arg7[%c0_5, %c0_6] : memref<8x1xf32, #tpu.memory_space<vmem>>, vector<8x1xf32>
    %cst_7 = arith.constant dense<0.000000e+00> : vector<8xf32>
    %10 = vector.multi_reduction <add>, %8, %cst_7 [1] : vector<8x128xf32> to vector<8xf32>
    %11 = vector.shape_cast %10 : vector<8xf32> to vector<8x1xf32>
    %12 = arith.addf %9, %11 : vector<8x1xf32>
    %c0_8 = arith.constant 0 : index
    %c0_9 = arith.constant 0 : index
    %13 = vector.load %arg7[%c0_8, %c0_9] : memref<8x1xf32, #tpu.memory_space<vmem>>, vector<8x1xf32>
    tpu.vector_store %arg7[%c0_8, %c0_9], %12 {strides = array<i32>} : memref<8x1xf32, #tpu.memory_space<vmem>>, vector<8x1xf32>,
    %c0_10 = arith.constant 0 : index
    %c0_11 = arith.constant 0 : index
    %14 = vector.load %arg6[%c0_10, %c0_11] : memref<8x128xf32, #tpu.memory_space<vmem>>, vector<8x128xf32>
    %c0_12 = arith.constant 0 : index
    %c0_13 = arith.constant 0 : index
    %15 = vector.load %arg4[%c0_12, %c0_13] : memref<128x128xf32, #tpu.memory_space<vmem>>, vector<128x128xf32>
    %cst_14 = arith.constant dense<0.000000e+00> : vector<8x128xf32>
    %16 = tpu.matmul %8, %15, %cst_14 {dimension_numbers = #tpu.dot_dimension_numbers<[1], [0], [0], [1], [0, 0, 1, 1], [], []>} : vector<8x128xf32>, vector<128x128xf32>, vector<8x128xf32> -> vector<8x128xf32>
    %17 = arith.addf %14, %16 : vector<8x128xf32>
    %c0_15 = arith.constant 0 : index
    %c0_16 = arith.constant 0 : index
    %18 = vector.load %arg6[%c0_15, %c0_16] : memref<8x128xf32, #tpu.memory_space<vmem>>, vector<8x128xf32>
    tpu.vector_store %arg6[%c0_15, %c0_16], %17 {strides = array<i32>} : memref<8x128xf32, #tpu.memory_space<vmem>>, vector<8x128xf32>,
    %c0_i32_17 = arith.constant 0 : i32
    %19 = arith.cmpi eq, %arg1, %c0_i32_17 : i32
    %20 = arith.extui %19 : i1 to i32
    %c0_i32_18 = arith.constant 0 : i32
    %21 = arith.cmpi ne, %20, %c0_i32_18 : i32
    scf.if %21 {
      %c0_19 = arith.constant 0 : index
      %c0_20 = arith.constant 0 : index
      %22 = vector.load %arg7[%c0_19, %c0_20] : memref<8x1xf32, #tpu.memory_space<vmem>>, vector<8x1xf32>
      %cst_21 = arith.constant 9.99999971E-10 : f32
      %23 = vector.broadcast %cst_21 : f32 to vector<8x1xf32>
      %24 = arith.addf %23, %22 : vector<8x1xf32>
      %cst_22 = arith.constant 1.000000e+00 : f32
      %25 = vector.broadcast %cst_22 : f32 to vector<8x1xf32>
      %26 = arith.divf %25, %24 : vector<8x1xf32>
      %c0_23 = arith.constant 0 : index
      %c0_24 = arith.constant 0 : index
      %27 = vector.load %arg6[%c0_23, %c0_24] : memref<8x128xf32, #tpu.memory_space<vmem>>, vector<8x128xf32>
      %28 = vector.broadcast %26 : vector<8x1xf32> to vector<8x128xf32>
      %29 = arith.mulf %27, %28 : vector<8x128xf32>
      %c0_25 = arith.constant 0 : index
      %c0_26 = arith.constant 0 : index
      %30 = vector.load %arg5[%c0_25, %c0_26] : memref<8x128xf32, #tpu.memory_space<vmem>>, vector<8x128xf32>
      tpu.vector_store %arg5[%c0_25, %c0_26], %29 {strides = array<i32>} : memref<8x128xf32, #tpu.memory_space<vmem>>, vector<8x128xf32>,
    } else {
    }
    return
  }
  func.func @transform_0(%arg0: i32, %arg1: i32) -> (i32, i32) {
    %c0_i32 = arith.constant 0 : i32
    %c0_i32_0 = arith.constant 0 : i32
    return %arg0, %c0_i32 : i32, i32
  }
  func.func @transform_1(%arg0: i32, %arg1: i32) -> (i32, i32) {
    %c0_i32 = arith.constant 0 : i32
    %c0_i32_0 = arith.constant 0 : i32
    return %c0_i32, %arg1 : i32, i32
  }
  func.func @transform_2(%arg0: i32, %arg1: i32) -> (i32, i32) {
    %c0_i32 = arith.constant 0 : i32
    %c0_i32_0 = arith.constant 0 : i32
    return %arg1, %c0_i32 : i32, i32
  }
  func.func @transform_3(%arg0: i32, %arg1: i32) -> (i32, i32) {
    %c0_i32 = arith.constant 0 : i32
    %c0_i32_0 = arith.constant 0 : i32
    return %arg0, %c0_i32 : i32, i32
  }
}

</mosaic_0001>

<bundles_post_ra>
// kernel: rbf_layer_forward.1
= control target key start
LH: loop header
LB: loop body
LE: loop exit
PB: predicated region body
PF: predicated region fallthrough
CT: control target
= control target key end

     0   :  { %vm30_vm0 = vcmask 1041408   ;;  %vm26_vm1 = vcmask 146432   ;;  %s268_s0 = inlined_call_operand.vmem [shape: f32[8,18], index: 0, kind: input, shape index: {}]   ;;  %s269_s1 = inlined_call_operand.vmem [shape: f32[18,128], index: 1, kind: input, shape index: {}]   ;;  %s270_s2 = inlined_call_operand.vmem [shape: f32[128,128], index: 2, kind: input, shape index: {}]   ;;  %s271_s3 = inlined_call_operand.hbm [shape: f32[8,128], index: 3, kind: output, shape index: {}]  }
   0x1   :  { %v25_v0 = vld [vmem:[%s269_s1 + $0x10] sm:$0x3]  ;;  %v24_v1 = vld [vmem:[%s269_s1 + $0x8] sm:$0xff]  ;;  %v79_v2 = vld [vmem:[%s270_s2 + $0x78] sm:$0xff] }
   0x2   :  { %146 = vmatpush.msk.msra.mxu0 %vm30_vm0, %v25_v0  ;;  %v78_v3 = vld [vmem:[%s270_s2 + $0x70] sm:$0xff]  ;;  %v23_v4 = vld [vmem:[%s269_s1] sm:$0xff]  ;;  %80 = vmatpush.msra.mxu1 %v79_v2  ;;  %v77_v6 = vld [vmem:[%s270_s2 + $0x68] sm:$0xff] }
   0x3   :  { %v22_v5 = vld [vmem:[%s268_s0] sm:$0xff] }
   0x4   :  { %48 = vmatpush.msra.mxu0 %v24_v1  ;;  %81 = vmatpush.msra.mxu1 %v78_v3 }
   0x5   :  { %8 = vsyncpa [#allocation5], 0  ;;  %v76_v7 = vld [vmem:[%s270_s2 + $0x60] sm:$0xff]  ;;  %v75_v8 = vld [vmem:[%s270_s2 + $0x58] sm:$0xff]  ;;  %vm20_vm2 = vcmask 7168   ;;  %v182_v24 = vmov 0.0  }
   0x6   :  { %49 = vmatpush.msra.mxu0 %v23_v4  ;;  %82 = vmatpush.msra.mxu1 %v77_v6  ;;  %v74_v9 = vld [vmem:[%s270_s2 + $0x50] sm:$0xff]  ;;  %v73_v10 = vld [vmem:[%s270_s2 + $0x48] sm:$0xff]  ;;  %v72_v11 = vld [vmem:[%s270_s2 + $0x40] sm:$0xff]  ;;  %21 = vst.msk [vmem:[#allocation3] sm:$0xff] %vm20_vm2, %v182_v24  ;;  %v183_v25 = vmov 0   ;;  %s137_s26 = sshll.u32 %s271_s3, 4  ;;  %s138_s26 = int_to_ptr.hbm [resolvable:$true] %s137_s26 }
   0x7   :  { %147 = vmatmul.msk.f32.vlgmr.msra.gmra.mxu0 %vm26_vm1, %v22_v5  ;;  %v71_v12 = vld [vmem:[%s270_s2 + $0x38] sm:$0xff]  ;;  %v70_v13 = vld [vmem:[%s270_s2 + $0x30] sm:$0xff]  ;;  %v69_v14 = vld [vmem:[%s270_s2 + $0x28] sm:$0xff]  ;;  %151 = vset.pattern.permute.xlu0 %v183_v25 }
   0x8   :  { %83 = vmatpush.msra.mxu1 %v76_v7  ;;  %v68_v15 = vld [vmem:[%s270_s2 + $0x20] sm:$0xff]  ;;  %v67_v16 = vld [vmem:[%s270_s2 + $0x18] sm:$0xff]  ;;  %v66_v17 = vld [vmem:[%s270_s2 + $0x10] sm:$0xff] }
   0x9   :  { %v65_v18 = vld [vmem:[%s270_s2 + $0x8] sm:$0xff]  ;;  %v64_v19 = vld [vmem:[%s270_s2] sm:$0xff]  ;;  %s184_s2 = smov [#allocation4]  }
   0xa   :  { %84 = vmatpush.msra.mxu1 %v75_v8  ;;  %s135_s23 = sshll.u32 %s184_s2, 4  ;;  %s136_s23 = int_to_ptr.vmem [resolvable:$true] %s135_s23 }
   0xc   :  { %85 = vmatpush.msra.mxu1 %v74_v9 }
   0xd   :  { %v57_v26 = vld [vmem:[#allocation3] sm:$0xff] }
   0xe   :  { %86 = vmatpush.msra.mxu1 %v73_v10 }
  0x10   :  { %87 = vmatpush.msra.mxu1 %v72_v11 }
  0x12   :  { %88 = vmatpush.msra.mxu1 %v71_v12 }
  0x14   :  { %89 = vmatpush.msra.mxu1 %v70_v13 }
  0x16   :  { %90 = vmatpush.msra.mxu1 %v69_v14 }
  0x18   :  { %91 = vmatpush.msra.mxu1 %v68_v15 }
  0x1a   :  { %92 = vmatpush.msra.mxu1 %v67_v16 }
  0x1c   :  { %93 = vmatpush.msra.mxu1 %v66_v17 }
  0x1e   :  { %94 = vmatpush.msra.mxu1 %v65_v18 }
  0x20   :  { %95 = vmatpush.msra.mxu1 %v64_v19 }
  0x84   :  { %v51_v20 = vpop.f32.mrf.mxu0 }
  0x85   :  { %v54_v21 = vmin.f32 %v51_v20, 0.0 }
  0x87   :  { %v55_v22 = vmul.f32 1.442695, %v54_v21 }
  0x89   :  { %152 = vpow2.f32 %v55_v22 }
  0x8f   :  { %v153_v23 = vpop.eup %152 }
  0x90   :  { %58 = vadd.xlane.f32.xlu0 %v153_v23  ;;  %96 = vmatmul.f32.vlgmr.msra.gmra.mxu1 %v153_v23 }
 0x103   :  { %v59_v27 = vpop.xlane.xlu0 %58 }
 0x104   :  { %v60_v28 = vadd.f32 %v59_v27, %v57_v26 }
 0x106   :  { %62 = vst.msk [vmem:[#allocation3] sm:$0xff] %vm20_vm2, %v60_v28 }
 0x10d   :  { %v105_v29 = vld [vmem:[#allocation3] sm:$0xff]  ;;  %v97_v41 = vpop.f32.mrf.mxu1 }
 0x10e   :  { %v106_v30 = vadd.f32 1e-09, %v105_v29 }
 0x110   :  { %154 = vrcp.f32 %v106_v30  ;;  %v118_v34 = vand.u32 2147483648, %v106_v30  ;;  %v116_v36 = vand.u32 2147483647, %v106_v30  ;;  %vm112_vm4 = vweird.f32 %v106_v30 }
 0x112   :  { %v119_v38 = vor.u32 1.1754944e-38, %v118_v34  ;;  %vm117_vm6 = vcmp.eq.f32.partialorder %v116_v36, 8.507059e+37 }
 0x116   :  { %v155_v31 = vpop.eup %154 }
 0x117   :  { %v108_v32 = vmul.f32 %v155_v31, %v106_v30  ;;  %vm113_vm3 = vweird.f32 %v155_v31 }
 0x118   :  { %vm114_vm5 = vmor %vm112_vm4, %vm113_vm3 }
 0x119   :  { %v109_v33 = vsub.f32 1.0, %v108_v32 }
 0x11b   :  { %v110_v35 = vmul.f32 %v155_v31, %v109_v33 }
 0x11d   :  { %v111_v37 = vadd.f32 %v155_v31, %v110_v35 }
 0x11f   :  { %v115_v39 = vsel %vm114_vm5, %v155_v31, %v111_v37 }
 0x120   :  { %v120_v40 = vsel %vm117_vm6, %v119_v38, %v115_v39 }
 0x121   :  { %125 = vperm.xlu0 %151, %v120_v40  }
 0x193   :  { %v126_v42 = vpop.permute.xlu0 %125 }
 0x194   :  { %v128_v43 = vmul.f32 %v126_v42, %v97_v41 }
 0x196   :  { %129 = vst [vmem:[#allocation4] sm:$0xff] %v128_v43 }
 0x197   :  { %140 = dma.vmem_to_hbm [thread:$0]  %s136_s23, 128, %s138_s26, [#allocation5]  }
 0x198   :  { %180 = dma.done.wait [#allocation5], 128  }
 0x199   :  { %181 = vsyncadd [#allocation5], 4294967168 }
 0x19a   :  { %145 = vsyncpa [#allocation5], 1 }

</bundles_post_ra>
